<compile_context>
chip_gen: v7x
topology: tpu7x:2x2x1
jax: 0.10.0
libtpu: 0.0.40
codegen_flags: <defaults>
</compile_context>

<pallas_src>
import functools

import jax
import jax.numpy as jnp
import numpy as np
from jax.experimental import pallas as pl
from jax.experimental.pallas import tpu as pltpu


# ---------------------------------------------------------------------------
# Pallas kernel: SimAM over one (row_block, H*W) tile.  Every row is an
# independent (batch, channel) pair; statistics are per row over the lane axis.
# ---------------------------------------------------------------------------
def _simam_kernel(x_ref, o_ref, *, inv_n, e_lambda):
    x = x_ref[...].astype(jnp.float32)                      # (rb, HW)
    hw = x.shape[-1]

    # One-pass per-row statistics (single reduction sweep over the tile).
    s1 = jnp.sum(x, axis=-1, keepdims=True)                 # (rb, 1)
    s2 = jnp.sum(x * x, axis=-1, keepdims=True)             # (rb, 1)
    mu = s1 * (1.0 / hw)                                    # mean
    sum_d = s2 - s1 * mu                                    # sum((x - mu)^2)

    # One divide per row, then broadcast-multiply (no per-element divide).
    inv = 1.0 / (4.0 * (sum_d * inv_n + e_lambda))          # (rb, 1)

    d = x - mu
    y = d * d * inv + 0.5
    o_ref[...] = (x * jax.nn.sigmoid(y)).astype(o_ref.dtype)


def _row_block(n_rows, hw, itemsize, vmem_budget):
    """Largest divisor of n_rows whose (in + out, double-buffered) tile fits
    the VMEM budget and keeps the sublane dim a multiple of 8 (or full)."""
    per_row = 4 * hw * itemsize                 # 2 buffers each for in and out
    cap = max(1, vmem_budget // per_row)
    for cand in range(min(n_rows, cap), 0, -1):
        if n_rows % cand == 0 and (cand % 8 == 0 or cand == n_rows):
            return cand
    return n_rows                               # fallback: whole thing per step


def simam(x_nchw, e_lambda=1e-4, vmem_budget=8 * 1024 * 1024):
    """SimAM forward for (B, C, H, W) input via one fused Pallas TPU kernel."""
    B, C, H, W = x_nchw.shape
    HW = H * W
    R = B * C

    # Free views: NCHW is contiguous, so (B, C, H, W) <-> (B*C, H*W) is a
    # bitcast-level reshape (no HBM traffic, no transpose).
    x2 = x_nchw.reshape(R, HW)

    rb = _row_block(R, HW, x_nchw.dtype.itemsize, vmem_budget)
    n_blocks = R // rb

    kernel = functools.partial(
        _simam_kernel, inv_n=1.0 / float(HW - 1), e_lambda=float(e_lambda))

    out2 = pl.pallas_call(
        kernel,
        out_shape=jax.ShapeDtypeStruct((R, HW), x_nchw.dtype),
        grid=(n_blocks,),
        in_specs=[pl.BlockSpec((rb, HW), lambda i: (i, 0))],
        out_specs=pl.BlockSpec((rb, HW), lambda i: (i, 0)),
        compiler_params=pltpu.CompilerParams(
            dimension_semantics=("parallel",)),
    )(x2)

    return out2.reshape(B, C, H, W)


# ---------------------------------------------------------------------------
# Pure-JAX reference (mirrors the PyTorch module; for correctness check only)
# ---------------------------------------------------------------------------
def _ref_simam(x, e_lambda=1e-4):
    _, _, H, W = x.shape
    n = float(H * W - 1)
    mu = jnp.mean(x, axis=(2, 3), keepdims=True)
    d = (x - mu) ** 2
    y = d / (4.0 * (jnp.sum(d, axis=(2, 3), keepdims=True) / n + e_lambda)) + 0.5
    return x * jax.nn.sigmoid(y)


# ---------------------------------------------------------------------------
if __name__ == "__main__":
    key = jax.random.PRNGKey(0)
    k1, k2 = jax.random.split(key)

    # Primary small shape: B=2, C=64, 16x16 (rows = 128 sublane-aligned,
    # H*W = 256 lane-aligned).
    x = jax.random.normal(k1, (2, 64, 16, 16), dtype=jnp.float32)
    out = jax.block_until_ready(simam(x))
    ref = jax.block_until_ready(_ref_simam(x))
    np.testing.assert_allclose(np.asarray(out), np.asarray(ref),
                               rtol=1e-4, atol=1e-4)

    # Same input, artificially small VMEM budget -> multi-block parallel grid
    # (exercises the tiled / megacore path).
    out_tiled = jax.block_until_ready(simam(x, vmem_budget=32 * 4 * 256 * 4))
    np.testing.assert_allclose(np.asarray(out_tiled), np.asarray(ref),
                               rtol=1e-4, atol=1e-4)

    # Odd channel count (sublane dim not a multiple of 8 -> full-dim block).
    x_small = jax.random.normal(k2, (2, 4, 16, 16), dtype=jnp.float32)
    out_small = jax.block_until_ready(simam(x_small))
    ref_small = jax.block_until_ready(_ref_simam(x_small))
    np.testing.assert_allclose(np.asarray(out_small), np.asarray(ref_small),
                               rtol=1e-4, atol=1e-4)

    print("KERNEL_OK")
</pallas_src>

<mosaic_0001>
module attributes {stable_mosaic.version = 11 : i64} {
  func.func @_simam_kernel(%arg0: i32, %arg1: memref<128x256xf32, #tpu.memory_space<vmem>>, %arg2: memref<128x256xf32, #tpu.memory_space<vmem>>) attributes {dimension_semantics = [#tpu.dimension_semantics<parallel>], iteration_bounds = array<i64: 1>, scalar_prefetch = 0 : i64, scratch_operands = 0 : i64, tpu.core_type = #tpu.core_type<tc>, window_params = [{transform_indices = @transform_0, window_bounds = array<i64: 128, 256>}, {transform_indices = @transform_1, window_bounds = array<i64: 128, 256>}]} {
    %c0 = arith.constant 0 : index
    %c0_0 = arith.constant 0 : index
    %0 = vector.load %arg1[%c0, %c0_0] : memref<128x256xf32, #tpu.memory_space<vmem>>, vector<128x256xf32>
    %cst = arith.constant dense<0.000000e+00> : vector<128xf32>
    %1 = vector.multi_reduction <add>, %0, %cst [1] : vector<128x256xf32> to vector<128xf32>
    %2 = vector.shape_cast %1 : vector<128xf32> to vector<128x1xf32>
    %3 = arith.mulf %0, %0 : vector<128x256xf32>
    %cst_1 = arith.constant dense<0.000000e+00> : vector<128xf32>
    %4 = vector.multi_reduction <add>, %3, %cst_1 [1] : vector<128x256xf32> to vector<128xf32>
    %5 = vector.shape_cast %4 : vector<128xf32> to vector<128x1xf32>
    %cst_2 = arith.constant 3.906250e-03 : f32
    %6 = vector.broadcast %cst_2 : f32 to vector<128x1xf32>
    %7 = arith.mulf %2, %6 : vector<128x1xf32>
    %8 = arith.mulf %2, %7 : vector<128x1xf32>
    %9 = arith.subf %5, %8 : vector<128x1xf32>
    %cst_3 = arith.constant 0.00392156886 : f32
    %10 = vector.broadcast %cst_3 : f32 to vector<128x1xf32>
    %11 = arith.mulf %9, %10 : vector<128x1xf32>
    %cst_4 = arith.constant 9.99999974E-5 : f32
    %12 = vector.broadcast %cst_4 : f32 to vector<128x1xf32>
    %13 = arith.addf %11, %12 : vector<128x1xf32>
    %cst_5 = arith.constant 4.000000e+00 : f32
    %14 = vector.broadcast %cst_5 : f32 to vector<128x1xf32>
    %15 = arith.mulf %14, %13 : vector<128x1xf32>
    %cst_6 = arith.constant 1.000000e+00 : f32
    %16 = vector.broadcast %cst_6 : f32 to vector<128x1xf32>
    %17 = arith.divf %16, %15 : vector<128x1xf32>
    %18 = vector.broadcast %7 : vector<128x1xf32> to vector<128x256xf32>
    %19 = arith.subf %0, %18 : vector<128x256xf32>
    %20 = arith.mulf %19, %19 : vector<128x256xf32>
    %21 = vector.broadcast %17 : vector<128x1xf32> to vector<128x256xf32>
    %22 = arith.mulf %20, %21 : vector<128x256xf32>
    %cst_7 = arith.constant 5.000000e-01 : f32
    %23 = vector.broadcast %cst_7 : f32 to vector<128x256xf32>
    %24 = arith.addf %22, %23 : vector<128x256xf32>
    %25 = arith.negf %24 : vector<128x256xf32>
    %26 = math.exp %25 : vector<128x256xf32>
    %cst_8 = arith.constant 1.000000e+00 : f32
    %27 = vector.broadcast %cst_8 : f32 to vector<128x256xf32>
    %28 = arith.addf %27, %26 : vector<128x256xf32>
    %29 = arith.divf %27, %28 : vector<128x256xf32>
    %30 = arith.mulf %0, %29 : vector<128x256xf32>
    %c0_9 = arith.constant 0 : index
    %c0_10 = arith.constant 0 : index
    %31 = vector.load %arg2[%c0_9, %c0_10] : memref<128x256xf32, #tpu.memory_space<vmem>>, vector<128x256xf32>
    tpu.vector_store %arg2[%c0_9, %c0_10], %30 {strides = array<i32>} : memref<128x256xf32, #tpu.memory_space<vmem>>, vector<128x256xf32>,
    return
  }
  func.func @transform_0(%arg0: i32) -> (i32, i32) {
    %c0_i32 = arith.constant 0 : i32
    %c0_i32_0 = arith.constant 0 : i32
    return %arg0, %c0_i32 : i32, i32
  }
  func.func @transform_1(%arg0: i32) -> (i32, i32) {
    %c0_i32 = arith.constant 0 : i32
    %c0_i32_0 = arith.constant 0 : i32
    return %arg0, %c0_i32 : i32, i32
  }
}

</mosaic_0001>

<bundles_post_ra>
// kernel: tpu_custom_call.1
= control target key start
LH: loop header
LB: loop body
LE: loop exit
PB: predicated region body
PF: predicated region fallthrough
CT: control target
= control target key end

     0   :  { %6 = vsyncpa [#allocation3], 0  ;;  %s1386_s0 = inlined_call_operand.hbm [shape: f32[128,256], index: 0, kind: input, shape index: {}]   ;;  %s1387_s1 = inlined_call_operand.hbm [shape: f32[128,256], index: 1, kind: output, shape index: {}]  }
   0x1   :  { %7 = vsyncpa [#allocation4], 0  ;;  %s976_s6 = smov [#allocation2]   ;;  %s928_s10 = scalar_lea.hbm %s1386_s0, 4096 }
   0x2   :  { %s13_s7 = sshll.u32 %s976_s6, 4  ;;  %p929_p0 = scmp.ne.s32.totalorder %s1386_s0, %s928_s10  ;;  %s14_s7 = int_to_ptr.vmem [resolvable:$true] %s13_s7 }
   0x3   :  { %p932_p1 = scmp.lt.u32.totalorder %s928_s10, %s1386_s0 }
   0x5   :  { %p934_p2 = pnand %p932_p1, %p929_p0 }
   0x7   :  { %937 = shalt.err (!%p934_p2)
}
   0x8   :  { %s938_s15 = scalar_lea.vmem %s14_s7, 4096  ;;  %p943_p4 = scmp.lt.s32.totalorder %s14_s7, %s14_s7 }
   0x9   :  { %p939_p3 = scmp.ne.s32.totalorder %s14_s7, %s938_s15  ;;  %p944_p5 = scmp.lt.s32.totalorder %s938_s15, %s938_s15 }
   0xb   :  { %p945_p6 = por %p944_p5, %p943_p4 }
   0xd   :  { %p946_p7 = pnand %p945_p6, %p939_p3 }
   0xf   :  { %949 = shalt.err (!%p946_p7)
}
  0x10   :  { %s977_s16 = smov 256   ;;  %s978_s17 = smov 16  }
  0x11   :  { %19 = dma.hbm_to_vmem [thread:$0]  %s1386_s0, 4096, %s14_s7, [#allocation3], %s977_s16, %s977_s16, %s978_s17  }
  0x12   :  { %972 = dma.done.wait [#allocation3], 4096  }
  0x13   :  { %973 = vsyncadd [#allocation3], 4294963200  ;;  %v1005_v0 = vld [vmem:[#allocation2 + $0x20] sm:$0xff]  ;;  %v1007_v1 = vld [vmem:[#allocation2 + $0x28] sm:$0xff]  ;;  %s979_s0 = smov [#allocation5]  }
  0x14   :  { %1401 = vst [vmem:[#allocation8_spill] sm:$0xff] %v1007_v1  ;;  %v1009_v2 = vld [vmem:[#allocation2] sm:$0xff]  ;;  %v61_v3 = vadd.f32 %v1007_v1, %v1005_v0  ;;  %v1013_v4 = vld [vmem:[#allocation2 + $0x8] sm:$0xff]  ;;  %v1015_v5 = vld [vmem:[#allocation2 + $0x30] sm:$0xff]  ;;  %v107_v56 = vmul.f32 %v1005_v0, %v1005_v0  ;;  %v108_v57 = vmul.f32 %v1007_v1, %v1007_v1  ;;  %s700_s20 = sshll.u32 %s979_s0, 4  ;;  %s701_s20 = int_to_ptr.vmem [resolvable:$true] %s700_s20 }
  0x15   :  { %v1017_v6 = vld [vmem:[#allocation2 + $0x38] sm:$0xff]  ;;  %v55_v7 = vadd.f32 %v1013_v4, %v1009_v2  ;;  %v1021_v8 = vld [vmem:[#allocation2 + $0x10] sm:$0xff]  ;;  %v1033_v14 = vld [vmem:[#allocation2 + $0x40] sm:$0xff]  ;;  %v103_v50 = vmul.f32 %v1009_v2, %v1009_v2  ;;  %v104_v51 = vmul.f32 %v1013_v4, %v1013_v4  ;;  %v109_v53 = vmul.f32 %v1015_v5, %v1015_v5  ;;  %s950_s21 = scalar_lea.vmem %s701_s20, 4096  ;;  %p955_p9 = scmp.lt.s32.totalorder %s701_s20, %s701_s20 }
  0x16   :  { %v1023_v9 = vld [vmem:[#allocation2 + $0x18] sm:$0xff]  ;;  %62 = vadd.xlane.f32.xlu1 %v61_v3  ;;  %v64_v10 = vadd.f32 %v1017_v6, %v1015_v5  ;;  %v1029_v12 = vld [vmem:[#allocation2 + $0x50] sm:$0xff]  ;;  %1404 = vst [vmem:[#allocation11_spill] sm:$0xff] %v1033_v14  ;;  %v1035_v15 = vld [vmem:[#allocation2 + $0x48] sm:$0xff]  ;;  %v105_v47 = vmul.f32 %v1021_v8, %v1021_v8  ;;  %v110_v54 = vmul.f32 %v1017_v6, %v1017_v6  ;;  %p951_p8 = scmp.ne.s32.totalorder %s701_s20, %s950_s21  ;;  %p956_p10 = scmp.lt.s32.totalorder %s950_s21, %s950_s21 }
  0x17   :  { %56 = vadd.xlane.f32.xlu0 %v55_v7  ;;  %v58_v11 = vadd.f32 %v1023_v9, %v1021_v8  ;;  %1402 = vst [vmem:[#allocation9_spill] sm:$0xff] %v1029_v12  ;;  %v1031_v13 = vld [vmem:[#allocation2 + $0x58] sm:$0xff]  ;;  %1405 = vst [vmem:[#allocation12_spill] sm:$0xff] %v1035_v15  ;;  %v67_v17 = vadd.f32 %v1035_v15, %v1033_v14  ;;  %v1041_v18 = vld [vmem:[#allocation2 + $0x70] sm:$0xff]  ;;  %v106_v48 = vmul.f32 %v1023_v9, %v1023_v9 }
  0x18   :  { %1403 = vst [vmem:[#allocation10_spill] sm:$0xff] %v1031_v13  ;;  %v70_v16 = vadd.f32 %v1031_v13, %v1029_v12  ;;  %v1043_v19 = vld [vmem:[#allocation2 + $0x78] sm:$0xff]  ;;  %v1045_v20 = vld [vmem:[#allocation2 + $0x60] sm:$0xff]  ;;  %v1047_v21 = vld [vmem:[#allocation2 + $0x68] sm:$0xff]  ;;  %v135_v55 = vadd.f32 %v104_v51, %v103_v50  ;;  %v144_v58 = vadd.f32 %v110_v54, %v109_v53  ;;  %v113_v59 = vmul.f32 %v1029_v12, %v1029_v12  ;;  %p957_p11 = por %p956_p10, %p955_p9 }
  0x19   :  { %v76_v22 = vadd.f32 %v1043_v19, %v1041_v18  ;;  %v73_v23 = vadd.f32 %v1047_v21, %v1045_v20  ;;  %v1053_v24 = vld [vmem:[#allocation2 + $0x90] sm:$0xff]  ;;  %v1055_v25 = vld [vmem:[#allocation2 + $0x98] sm:$0xff]  ;;  %v1057_v26 = vld [vmem:[#allocation2 + $0x80] sm:$0xff]  ;;  %v138_v52 = vadd.f32 %v106_v48, %v105_v47  ;;  %v114_v60 = vmul.f32 %v1031_v13, %v1031_v13 }
  0x1a   :  { %65 = vadd.xlane.f32.xlu1 %v64_v10  ;;  %v1059_v27 = vld [vmem:[#allocation2 + $0x88] sm:$0xff]  ;;  %v82_v28 = vadd.f32 %v1055_v25, %v1053_v24  ;;  %v1065_v30 = vld [vmem:[#allocation2 + $0xb0] sm:$0xff]  ;;  %v1067_v31 = vld [vmem:[#allocation2 + $0xb8] sm:$0xff]  ;;  %v141_v61 = vadd.f32 %v108_v57, %v107_v56  ;;  %v111_v62 = vmul.f32 %v1033_v14, %v1033_v14  ;;  %v112_v63 = vmul.f32 %v1035_v15, %v1035_v15  ;;  %p958_p12 = pnand %p957_p11, %p951_p8 }
  0x1b   :  { %59 = vadd.xlane.f32.xlu0 %v58_v11  ;;  %v79_v29 = vadd.f32 %v1059_v27, %v1057_v26  ;;  %v1069_v32 = vld [vmem:[#allocation2 + $0xa0] sm:$0xff]  ;;  %v1071_v33 = vld [vmem:[#allocation2 + $0xa8] sm:$0xff]  ;;  %v88_v34 = vadd.f32 %v1067_v31, %v1065_v30  ;;  %v1077_v36 = vld [vmem:[#allocation2 + $0xd0] sm:$0xff]  ;;  %v150_v3 = vadd.f32 %v114_v60, %v113_v59  ;;  %v117_v7 = vmul.f32 %v1041_v18, %v1041_v18 }
  0x1c   :  { %1406 = vst [vmem:[#allocation13_spill] sm:$0xff] %v1071_v33  ;;  %v85_v35 = vadd.f32 %v1071_v33, %v1069_v32  ;;  %1407 = vst [vmem:[#allocation14_spill] sm:$0xff] %v1077_v36  ;;  %v1079_v37 = vld [vmem:[#allocation2 + $0xd8] sm:$0xff]  ;;  %v1081_v38 = vld [vmem:[#allocation2 + $0xc0] sm:$0xff]  ;;  %v118_v10 = vmul.f32 %v1043_v19, %v1043_v19  ;;  %v147_v11 = vadd.f32 %v112_v63, %v111_v62 }
  0x1d   :  { %1408 = vst [vmem:[#allocation15_spill] sm:$0xff] %v1079_v37  ;;  %1409 = vst [vmem:[#allocation16_spill] sm:$0xff] %v1081_v38  ;;  %v1083_v39 = vld [vmem:[#allocation2 + $0xc8] sm:$0xff]  ;;  %v94_v40 = vadd.f32 %v1079_v37, %v1077_v36  ;;  %v1089_v42 = vld [vmem:[#allocation2 + $0xf0] sm:$0xff]  ;;  %v123_v48 = vmul.f32 %v1069_v32, %v1069_v32  ;;  %v129_v51 = vmul.f32 %v1077_v36, %v1077_v36 }
  0x1e   :  { %71 = vadd.xlane.f32.xlu1 %v70_v16  ;;  %1410 = vst [vmem:[#allocation17_spill] sm:$0xff] %v1083_v39  ;;  %v91_v41 = vadd.f32 %v1083_v39, %v1081_v38  ;;  %1411 = vst [vmem:[#allocation18_spill] sm:$0xff] %v1089_v42  ;;  %v1091_v43 = vld [vmem:[#allocation2 + $0xf8] sm:$0xff]  ;;  %v1093_v44 = vld [vmem:[#allocation2 + $0xe0] sm:$0xff]  ;;  %v115_v16 = vmul.f32 %v1045_v20, %v1045_v20  ;;  %v127_v54 = vmul.f32 %v1081_v38, %v1081_v38 }
  0x1f   :  { %68 = vadd.xlane.f32.xlu0 %v67_v17  ;;  %1412 = vst [vmem:[#allocation19_spill] sm:$0xff] %v1091_v43  ;;  %1413 = vst [vmem:[#allocation20_spill] sm:$0xff] %v1093_v44  ;;  %v1095_v45 = vld [vmem:[#allocation2 + $0xe8] sm:$0xff]  ;;  %v100_v46 = vadd.f32 %v1091_v43, %v1089_v42  ;;  %v116_v17 = vmul.f32 %v1047_v21, %v1047_v21  ;;  %v133_v57 = vmul.f32 %v1089_v42, %v1089_v42 }
  0x20   :  { %v97_v49 = vadd.f32 %v1095_v45, %v1093_v44  ;;  %v131_v60 = vmul.f32 %v1093_v44, %v1093_v44 }
  0x22   :  { %77 = vadd.xlane.f32.xlu1 %v76_v22  ;;  %v156_v22 = vadd.f32 %v118_v10, %v117_v7 }
  0x23   :  { %74 = vadd.xlane.f32.xlu0 %v73_v23  ;;  %v121_v23 = vmul.f32 %v1053_v24, %v1053_v24 }
  0x26   :  { %83 = vadd.xlane.f32.xlu1 %v82_v28  ;;  %v122_v28 = vmul.f32 %v1055_v25, %v1055_v25 }
  0x27   :  { %80 = vadd.xlane.f32.xlu0 %v79_v29  ;;  %v153_v29 = vadd.f32 %v116_v17, %v115_v16 }
  0x2a   :  { %89 = vadd.xlane.f32.xlu1 %v88_v34  ;;  %v119_v34 = vmul.f32 %v1057_v26, %v1057_v26 }
  0x2b   :  { %86 = vadd.xlane.f32.xlu0 %v85_v35  ;;  %v120_v35 = vmul.f32 %v1059_v27, %v1059_v27 }
  0x2d   :  { %v159_v47 = vadd.f32 %v120_v35, %v119_v34 }
  0x2e   :  { %95 = vadd.xlane.f32.xlu1 %v94_v40  ;;  %v162_v40 = vadd.f32 %v122_v28, %v121_v23 }
  0x2f   :  { %92 = vadd.xlane.f32.xlu0 %v91_v41  ;;  %v125_v41 = vmul.f32 %v1065_v30, %v1065_v30 }
  0x32   :  { %101 = vadd.xlane.f32.xlu1 %v100_v46  ;;  %v126_v46 = vmul.f32 %v1067_v31, %v1067_v31 }
  0x33   :  { %98 = vadd.xlane.f32.xlu0 %v97_v49  ;;  %v124_v49 = vmul.f32 %v1071_v33, %v1071_v33 }
  0x34   :  { %v168_v50 = vadd.f32 %v126_v46, %v125_v41 }
  0x35   :  { %v165_v53 = vadd.f32 %v124_v49, %v123_v48 }
  0x36   :  { %139 = vadd.xlane.f32.xlu1 %v138_v52  ;;  %v130_v52 = vmul.f32 %v1079_v37, %v1079_v37 }
  0x37   :  { %136 = vadd.xlane.f32.xlu0 %v135_v55  ;;  %v128_v55 = vmul.f32 %v1083_v39, %v1083_v39 }
  0x38   :  { %v174_v56 = vadd.f32 %v130_v52, %v129_v51 }
  0x39   :  { %v171_v59 = vadd.f32 %v128_v55, %v127_v54 }
  0x3a   :  { %145 = vadd.xlane.f32.xlu1 %v144_v58  ;;  %v134_v58 = vmul.f32 %v1091_v43, %v1091_v43 }
  0x3b   :  { %142 = vadd.xlane.f32.xlu0 %v141_v61  ;;  %v132_v61 = vmul.f32 %v1095_v45, %v1095_v45 }
  0x3c   :  { %v180_v62 = vadd.f32 %v134_v58, %v133_v57 }
  0x3d   :  { %v177_v63 = vadd.f32 %v132_v61, %v131_v60 }
  0x3e   :  { %151 = vadd.xlane.f32.xlu1 %v150_v3 }
  0x3f   :  { %148 = vadd.xlane.f32.xlu0 %v147_v11 }
  0x42   :  { %157 = vadd.xlane.f32.xlu1 %v156_v22 }
  0x43   :  { %154 = vadd.xlane.f32.xlu0 %v153_v29 }
  0x46   :  { %163 = vadd.xlane.f32.xlu1 %v162_v40 }
  0x47   :  { %160 = vadd.xlane.f32.xlu0 %v159_v47 }
  0x4a   :  { %169 = vadd.xlane.f32.xlu1 %v168_v50 }
  0x4b   :  { %166 = vadd.xlane.f32.xlu0 %v165_v53 }
  0x4e   :  { %175 = vadd.xlane.f32.xlu1 %v174_v56 }
  0x4f   :  { %172 = vadd.xlane.f32.xlu0 %v171_v59 }
  0x52   :  { %181 = vadd.xlane.f32.xlu1 %v180_v62 }
  0x53   :  { %178 = vadd.xlane.f32.xlu0 %v177_v63 }
  0xa3   :  { %v63_v3 = vpop.xlane.xlu1 %62 }
  0xa4   :  { %v57_v7 = vpop.xlane.xlu0 %56  ;;  %v185_v35 = vmul.f32 0.00390625, %v63_v3 }
  0xa5   :  { %v183_v40 = vmul.f32 0.00390625, %v57_v7 }
  0xa6   :  { %v315_v48 = vsub.f32 %v1005_v0, %v185_v35  ;;  %v316_v50 = vsub.f32 %v1007_v1, %v185_v35  ;;  %v201_v57 = vmul.f32 %v185_v35, %v63_v3 }
  0xa7   :  { %v66_v10 = vpop.xlane.xlu1 %65  ;;  %v311_v51 = vsub.f32 %v1009_v2, %v183_v40  ;;  %v312_v52 = vsub.f32 %v1013_v4, %v183_v40  ;;  %v199_v58 = vmul.f32 %v183_v40, %v57_v7 }
  0xa8   :  { %v60_v11 = vpop.xlane.xlu0 %59  ;;  %v186_v46 = vmul.f32 0.00390625, %v66_v10  ;;  %v1189_v61 = vmul.f32 %v315_v48, %v315_v48  ;;  %v1193_v43 = vmul.f32 %v316_v50, %v316_v50 }
  0xa9   :  { %v184_v49 = vmul.f32 0.00390625, %v60_v11  ;;  %v1195_v42 = vmul.f32 %v311_v51, %v311_v51  ;;  %v1197_v39 = vmul.f32 %v312_v52, %v312_v52 }
  0xaa   :  { %v317_v54 = vsub.f32 %v1015_v5, %v186_v46  ;;  %v318_v59 = vsub.f32 %v1017_v6, %v186_v46  ;;  %v202_v38 = vmul.f32 %v186_v46, %v66_v10 }
  0xab   :  { %v72_v16 = vpop.xlane.xlu1 %71  ;;  %v200_v62 = vmul.f32 %v184_v49, %v60_v11  ;;  %v313_v63 = vsub.f32 %v1021_v8, %v184_v49  ;;  %v314_v44 = vsub.f32 %v1023_v9, %v184_v49 }
  0xac   :  { %v69_v17 = vpop.xlane.xlu0 %68  ;;  %v188_v55 = vmul.f32 0.00390625, %v72_v16  ;;  %v1199_v3 = vmul.f32 %v317_v54, %v317_v54  ;;  %v1203_v48 = vmul.f32 %v318_v59, %v318_v59 }
  0xad   :  { %v187_v60 = vmul.f32 0.00390625, %v69_v17  ;;  %v1207_v36 = vmul.f32 %v313_v63, %v313_v63  ;;  %v1209_v52 = vmul.f32 %v314_v44, %v314_v44 }
  0xae   :  { %v321_v7 = vsub.f32 %v1029_v12, %v188_v55  ;;  %v322_v35 = vsub.f32 %v1031_v13, %v188_v55  ;;  %v204_v54 = vmul.f32 %v188_v55, %v72_v16 }
  0xaf   :  { %v78_v22 = vpop.xlane.xlu1 %77  ;;  %v319_v49 = vsub.f32 %v1033_v14, %v187_v60  ;;  %v320_v50 = vsub.f32 %v1035_v15, %v187_v60  ;;  %v203_v33 = vmul.f32 %v187_v60, %v69_v17 }
  0xb0   :  { %v1165_v23 = vpop.xlane.xlu0 %74  ;;  %v190_v10 = vmul.f32 0.00390625, %v78_v22  ;;  %v1214_v59 = vmul.f32 %v322_v35, %v322_v35 }
  0xb1   :  { %v189_v12 = vmul.f32 0.00390625, %v1165_v23  ;;  %v1218_v63 = vmul.f32 %v320_v50, %v320_v50 }
  0xb2   :  { %v325_v16 = vsub.f32 %v1041_v18, %v190_v10  ;;  %v326_v60 = vsub.f32 %v1043_v19, %v190_v10 }
  0xb3   :  { %v1167_v28 = vpop.xlane.xlu1 %83 }
  0xb4   :  { %v1169_v29 = vpop.xlane.xlu0 %80 }
  0xb7   :  { %v1171_v45 = vpop.xlane.xlu1 %89 }
  0xb8   :  { %v1173_v34 = vpop.xlane.xlu0 %86 }
  0xbb   :  { %v1175_v41 = vpop.xlane.xlu1 %95 }
  0xbc   :  { %v1177_v47 = vpop.xlane.xlu0 %92 }
  0xbf   :  { %v1183_v53 = vpop.xlane.xlu1 %101 }
  0xc0   :  { %v1186_v56 = vpop.xlane.xlu0 %98 }
  0xc3   :  { %v140_v37 = vpop.xlane.xlu1 %139 }
  0xc4   :  { %v216_v40 = vsub.f32 %v140_v37, %v200_v62  ;;  %v137_v11 = vpop.xlane.xlu0 %136  ;;  %v1212_v62 = vmul.f32 %v321_v7, %v321_v7  ;;  %v205_v7 = vmul.f32 %v189_v12, %v1165_v23  ;;  %v1227_v23 = vmul.f32 %v325_v16, %v325_v16 }
  0xc5   :  { %v215_v51 = vsub.f32 %v137_v11, %v199_v58  ;;  %v1216_v58 = vmul.f32 %v319_v49, %v319_v49 }
  0xc6   :  { %v232_v46 = vmul.f32 0.003921569, %v216_v40  ;;  %v206_v40 = vmul.f32 %v190_v10, %v78_v22 }
  0xc7   :  { %v231_v13 = vmul.f32 0.003921569, %v215_v51  ;;  %v146_v37 = vpop.xlane.xlu1 %145 }
  0xc8   :  { %v248_v14 = vadd.f32 0.0001, %v232_v46  ;;  %v218_v1 = vsub.f32 %v146_v37, %v202_v38  ;;  %v143_v15 = vpop.xlane.xlu0 %142  ;;  %v323_v38 = vsub.f32 %v1045_v20, %v189_v12 }
  0xc9   :  { %v247_v44 = vadd.f32 0.0001, %v231_v13  ;;  %v217_v11 = vsub.f32 %v143_v15, %v201_v57  ;;  %v192_v13 = vmul.f32 0.00390625, %v1167_v28  ;;  %v1229_v57 = vmul.f32 %v326_v60, %v326_v60 }
  0xca   :  { %v264_v17 = vmul.f32 4.0, %v248_v14  ;;  %v234_v55 = vmul.f32 0.003921569, %v218_v1  ;;  %v324_v1 = vsub.f32 %v1047_v21, %v189_v12  ;;  %v191_v14 = vmul.f32 0.00390625, %v1169_v29 }
  0xcb   :  { %v263_v35 = vmul.f32 4.0, %v247_v44  ;;  %v233_v51 = vmul.f32 0.003921569, %v217_v11  ;;  %v152_v46 = vpop.xlane.xlu1 %151 }
  0xcc   :  { %748 = vrcp.f32 %v264_v17  ;;  %v250_v49 = vadd.f32 0.0001, %v234_v55  ;;  %v220_v50 = vsub.f32 %v152_v46, %v204_v54  ;;  %v149_v37 = vpop.xlane.xlu0 %148  ;;  %v1231_v54 = vmul.f32 %v323_v38, %v323_v38 }
  0xcd   :  { %750 = vrcp.f32 %v263_v35  ;;  %v249_v15 = vadd.f32 0.0001, %v233_v51  ;;  %v219_v18 = vsub.f32 %v149_v37, %v203_v33  ;;  %v329_v33 = vsub.f32 %v1053_v24, %v192_v13 }
  0xce   :  { %v266_v19 = vmul.f32 4.0, %v250_v49  ;;  %v236_v22 = vmul.f32 0.003921569, %v220_v50  ;;  %v330_v35 = vsub.f32 %v1055_v25, %v192_v13  ;;  %v327_v16 = vsub.f32 %v1057_v26, %v191_v14 }
  0xcf   :  { %v265_v20 = vmul.f32 4.0, %v249_v15  ;;  %v235_v10 = vmul.f32 0.003921569, %v219_v18  ;;  %v158_v44 = vpop.xlane.xlu1 %157  ;;  %v1236_v46 = vmul.f32 %v324_v1, %v324_v1  ;;  %v208_v38 = vmul.f32 %v192_v13, %v1167_v28 }
  0xd0   :  { %752 = vrcp.f32 %v266_v19  ;;  %v252_v11 = vadd.f32 0.0001, %v236_v22  ;;  %v222_v17 = vsub.f32 %v158_v44, %v206_v40  ;;  %v155_v55 = vpop.xlane.xlu0 %154  ;;  %v1240_v40 = vmul.f32 %v191_v14, %v1169_v29 }
  0xd1   :  { %754 = vrcp.f32 %v265_v20  ;;  %v251_v12 = vadd.f32 0.0001, %v235_v10  ;;  %v221_v21 = vsub.f32 %v155_v55, %v205_v7  ;;  %v1243_v24 = vmul.f32 0.00390625, %v1171_v45 }
  0xd2   :  { %v268_v60 = vmul.f32 4.0, %v252_v11  ;;  %v238_v51 = vmul.f32 0.003921569, %v222_v17  ;;  %v1245_v25 = vmul.f32 %v329_v33, %v329_v33  ;;  %v1248_v26 = vsub.f32 %v1059_v27, %v191_v14 }
  0xd3   :  { %v267_v49 = vmul.f32 4.0, %v251_v12  ;;  %v237_v50 = vmul.f32 0.003921569, %v221_v21  ;;  %v164_v37 = vpop.xlane.xlu1 %163  ;;  %v1250_v28 = vmul.f32 %v330_v35, %v330_v35  ;;  %v1252_v13 = vmul.f32 %v327_v16, %v327_v16 }
  0xd4   :  { %756 = vrcp.f32 %v268_v60  ;;  %v254_v7 = vadd.f32 0.0001, %v238_v51  ;;  %v224_v29 = vsub.f32 %v164_v37, %v208_v38  ;;  %v1255_v22 = vmul.f32 0.00390625, %v1173_v34  ;;  %v161_v35 = vpop.xlane.xlu0 %160 }
  0xd5   :  { %758 = vrcp.f32 %v267_v49  ;;  %v253_v15 = vadd.f32 0.0001, %v237_v50  ;;  %v1261_v27 = vmul.f32 %v1243_v24, %v1171_v45  ;;  %v1265_v14 = vsub.f32 %v1065_v30, %v1243_v24 }
  0xd6   :  { %v749_v18 = vpop.eup %748  ;;  %v270_v1 = vmul.f32 4.0, %v254_v7  ;;  %v1270_v55 = vmul.f32 0.00390625, %v1175_v41  ;;  %v240_v45 = vmul.f32 0.003921569, %v224_v29 }
  0xd7   :  { %v751_v19 = vpop.eup %750  ;;  %v377_v20 = vmul.f32 %v749_v18, %v1207_v36  ;;  %v378_v10 = vmul.f32 %v749_v18, %v1209_v52  ;;  %v269_v44 = vmul.f32 4.0, %v253_v15  ;;  %v223_v15 = vsub.f32 %v161_v35, %v1240_v40 }
  0xd8   :  { %v375_v11 = vmul.f32 %v751_v19, %v1195_v42  ;;  %v376_v17 = vmul.f32 %v751_v19, %v1197_v39  ;;  %760 = vrcp.f32 %v270_v1  ;;  %v256_v19 = vadd.f32 0.0001, %v240_v45 }
  0xd9   :  { %v409_v33 = vadd.f32 0.5, %v377_v20  ;;  %v410_v36 = vadd.f32 0.5, %v378_v10  ;;  %762 = vrcp.f32 %v269_v44 }
  0xda   :  { %v753_v52 = vpop.eup %752  ;;  %v407_v12 = vadd.f32 0.5, %v375_v11  ;;  %v408_v21 = vadd.f32 0.5, %v376_v17 }
  0xdb   :  { %v755_v16 = vpop.eup %754  ;;  %v714_v60 = vmul.f32 -1.442695, %v409_v33  ;;  %v715_v30 = vmul.f32 -1.442695, %v410_v36  ;;  %v381_v51 = vmul.f32 %v753_v52, %v1199_v3  ;;  %v382_v42 = vmul.f32 %v753_v52, %v1203_v48 }
  0xdc   :  { %v712_v39 = vmul.f32 -1.442695, %v407_v12  ;;  %v713_v38 = vmul.f32 -1.442695, %v408_v21  ;;  %v379_v49 = vmul.f32 %v755_v16, %v1189_v61  ;;  %v380_v50 = vmul.f32 %v755_v16, %v1193_v43  ;;  %v170_v12 = vpop.xlane.xlu1 %169  ;;  %v167_v21 = vpop.xlane.xlu0 %166 }
  0xdd   :  { %764 = vpow2.f32 %v714_v60  ;;  %v413_v37 = vadd.f32 0.5, %v381_v51  ;;  %v414_v7 = vadd.f32 0.5, %v382_v42  ;;  %v1282_v33 = vmul.f32 0.00390625, %v1177_v47 }
  0xde   :  { %v757_v18 = vpop.eup %756  ;;  %766 = vpow2.f32 %v715_v30  ;;  %v411_v1 = vadd.f32 0.5, %v379_v49  ;;  %v412_v29 = vadd.f32 0.5, %v380_v50  ;;  %v239_v52 = vmul.f32 0.003921569, %v223_v15 }
  0xdf   :  { %v759_v20 = vpop.eup %758  ;;  %768 = vpow2.f32 %v712_v39  ;;  %v718_v3 = vmul.f32 -1.442695, %v413_v37  ;;  %v719_v48 = vmul.f32 -1.442695, %v414_v7  ;;  %v385_v10 = vmul.f32 %v757_v18, %v1212_v62 }
  0xe0   :  { %770 = vpow2.f32 %v713_v38  ;;  %v716_v61 = vmul.f32 -1.442695, %v411_v1  ;;  %v717_v44 = vmul.f32 -1.442695, %v412_v29  ;;  %v386_v43 = vmul.f32 %v757_v18, %v1214_v59  ;;  %v173_v1 = vpop.xlane.xlu0 %172 }
  0xe1   :  { %772 = vpow2.f32 %v718_v3  ;;  %v417_v11 = vadd.f32 0.5, %v385_v10  ;;  %v383_v40 = vmul.f32 %v759_v20, %v1216_v58  ;;  %v384_v17 = vmul.f32 %v759_v20, %v1218_v63 }
  0xe2   :  { %774 = vpow2.f32 %v719_v48  ;;  %v418_v36 = vadd.f32 0.5, %v386_v43  ;;  %v761_v62 = vpop.eup %760  ;;  %v1285_v60 = vmul.f32 0.00390625, %v1183_v53  ;;  %v272_v63 = vmul.f32 4.0, %v256_v19 }
  0xe3   :  { %776 = vpow2.f32 %v716_v61  ;;  %v722_v45 = vmul.f32 -1.442695, %v417_v11  ;;  %v415_v35 = vadd.f32 0.5, %v383_v40  ;;  %v416_v16 = vadd.f32 0.5, %v384_v17  ;;  %v763_v59 = vpop.eup %762 }
  0xe4   :  { %778 = vpow2.f32 %v717_v44  ;;  %v723_v58 = vmul.f32 -1.442695, %v418_v36  ;;  %v226_v42 = vsub.f32 %v170_v12, %v1261_v27  ;;  %v209_v39 = vmul.f32 %v1255_v22, %v1173_v34 }
  0xe5   :  { %780 = vpow2.f32 %v722_v45  ;;  %v720_v30 = vmul.f32 -1.442695, %v415_v35  ;;  %v721_v51 = vmul.f32 -1.442695, %v416_v16  ;;  %v1292_v38 = vmul.f32 %v1270_v55, %v1175_v41 }
  0xe6   :  { %782 = vpow2.f32 %v723_v58  ;;  %v389_v49 = vmul.f32 %v761_v62, %v1227_v23  ;;  %v1297_v37 = vmul.f32 %v1282_v33, %v1177_v47  ;;  %v1300_v7 = vmul.f32 0.00390625, %v1186_v56  ;;  %v176_v23 = vpop.xlane.xlu1 %175  ;;  %v179_v58 = vpop.xlane.xlu0 %178 }
  0xe7   :  { %v765_v50 = vpop.eup %764  ;;  %784 = vpow2.f32 %v720_v30  ;;  %v255_v27 = vadd.f32 0.0001, %v239_v52  ;;  %v1304_v34 = vmul.f32 %v1285_v60, %v1183_v53  ;;  %v390_v18 = vmul.f32 %v761_v62, %v1229_v57 }
  0xe8   :  { %v767_v15 = vpop.eup %766  ;;  %v537_v41 = vadd.f32 1.0, %v765_v50  ;;  %786 = vpow2.f32 %v721_v51  ;;  %v387_v47 = vmul.f32 %v763_v59, %v1231_v54  ;;  %v242_v20 = vmul.f32 0.003921569, %v226_v42 }
  0xe9   :  { %v769_v29 = vpop.eup %768  ;;  %v538_v19 = vadd.f32 1.0, %v767_v15  ;;  %788 = vrcp.f32 %v272_v63  ;;  %v421_v10 = vadd.f32 0.5, %v389_v49  ;;  %v225_v61 = vsub.f32 %v167_v21, %v209_v39 }
  0xea   :  { %v771_v3 = vpop.eup %770  ;;  %790 = vrcp.f32 %v537_v41  ;;  %v535_v48 = vadd.f32 1.0, %v769_v29  ;;  %v213_v53 = vmul.f32 %v1300_v7, %v1186_v56  ;;  %v1310_v57 = vmul.f32 4.0, %v255_v27  ;;  %v182_v16 = vpop.xlane.xlu1 %181 }
  0xeb   :  { %v773_v44 = vpop.eup %772  ;;  %792 = vrcp.f32 %v538_v19  ;;  %v536_v43 = vadd.f32 1.0, %v771_v3  ;;  %v422_v17 = vadd.f32 0.5, %v390_v18  ;;  %v388_v54 = vmul.f32 %v763_v59, %v1236_v46 }
  0xec   :  { %v775_v11 = vpop.eup %774  ;;  %794 = vrcp.f32 %v535_v48  ;;  %v541_v40 = vadd.f32 1.0, %v773_v44  ;;  %v419_v12 = vadd.f32 0.5, %v387_v47  ;;  %v1313_v62 = vadd.f32 0.0001, %v242_v20 }
  0xed   :  { %v777_v36 = vpop.eup %776  ;;  %796 = vrcp.f32 %v536_v43  ;;  %v542_v52 = vadd.f32 1.0, %v775_v11  ;;  %v726_v56 = vmul.f32 -1.442695, %v421_v10  ;;  %v241_v35 = vmul.f32 0.003921569, %v225_v61 }
  0xee   :  { %v779_v21 = vpop.eup %778  ;;  %798 = vrcp.f32 %v541_v40  ;;  %v539_v45 = vadd.f32 1.0, %v777_v36  ;;  %v228_v51 = vsub.f32 %v176_v23, %v1292_v38  ;;  %v227_v46 = vsub.f32 %v173_v1, %v1297_v37 }
  0xef   :  { %v781_v63 = vpop.eup %780  ;;  %800 = vrcp.f32 %v542_v52  ;;  %v540_v30 = vadd.f32 1.0, %v779_v21  ;;  %v727_v39 = vmul.f32 -1.442695, %v422_v17  ;;  %v420_v49 = vadd.f32 0.5, %v388_v54 }
  0xf0   :  { %v783_v59 = vpop.eup %782  ;;  %802 = vrcp.f32 %v539_v45  ;;  %v545_v42 = vadd.f32 1.0, %v781_v63  ;;  %v230_v15 = vsub.f32 %v182_v16, %v1304_v34  ;;  %v229_v41 = vsub.f32 %v179_v58, %v213_v53 }
  0xf1   :  { %v785_v50 = vpop.eup %784  ;;  %804 = vrcp.f32 %v540_v30  ;;  %v546_v27 = vadd.f32 1.0, %v783_v59  ;;  %v724_v19 = vmul.f32 -1.442695, %v419_v12  ;;  %v257_v47 = vadd.f32 0.0001, %v241_v35  ;;  %v1414_v59 = vld [vmem:[#allocation8_spill] sm:$0xff] }
  0xf2   :  { %v787_v18 = vpop.eup %786  ;;  %806 = vrcp.f32 %v545_v42  ;;  %v543_v29 = vadd.f32 1.0, %v785_v50  ;;  %v244_v37 = vmul.f32 0.003921569, %v228_v51  ;;  %v243_v23 = vmul.f32 0.003921569, %v227_v46 }
  0xf3   :  { %v789_v20 = vpop.eup %788  ;;  %808 = vrcp.f32 %v546_v27  ;;  %v544_v38 = vadd.f32 1.0, %v787_v18  ;;  %v725_v3 = vmul.f32 -1.442695, %v420_v49  ;;  %v246_v44 = vmul.f32 0.003921569, %v230_v15  ;;  %v1416_v27 = vld [vmem:[#allocation13_spill] sm:$0xff] }
  0xf4   :  { %v791_v1 = vpop.eup %790  ;;  %810 = vrcp.f32 %v543_v29  ;;  %v393_v48 = vmul.f32 %v789_v20, %v1245_v25  ;;  %v394_v10 = vmul.f32 %v789_v20, %v1250_v28  ;;  %v245_v53 = vmul.f32 0.003921569, %v229_v41 }
  0xf5   :  { %v793_v61 = vpop.eup %792  ;;  %v633_v34 = vmul.f32 %v791_v1, %v1021_v8  ;;  %812 = vrcp.f32 %v544_v38  ;;  %v260_v25 = vadd.f32 0.0001, %v244_v37  ;;  %v259_v52 = vadd.f32 0.0001, %v243_v23  ;;  %v1419_v37 = vld [vmem:[#allocation14_spill] sm:$0xff] }
  0xf6   :  { %v795_v43 = vpop.eup %794  ;;  %v634_v11 = vmul.f32 %v793_v61, %v1023_v9  ;;  %814 = vpow2.f32 %v726_v56  ;;  %v425_v40 = vadd.f32 0.5, %v393_v48  ;;  %v426_v17 = vadd.f32 0.5, %v394_v10  ;;  %v1421_v48 = vld [vmem:[#allocation15_spill] sm:$0xff] }
  0xf7   :  { %v797_v54 = vpop.eup %796  ;;  %665 = vst [vmem:[#allocation5 + $0x10] sm:$0xff] %v633_v34  ;;  %v631_v36 = vmul.f32 %v795_v43, %v1009_v2  ;;  %816 = vpow2.f32 %v727_v39  ;;  %v274_v56 = vmul.f32 4.0, %v1313_v62  ;;  %v262_v35 = vadd.f32 0.0001, %v246_v44 }
  0xf8   :  { %v799_v28 = vpop.eup %798  ;;  %666 = vst [vmem:[#allocation5 + $0x18] sm:$0xff] %v634_v11  ;;  %v632_v8 = vmul.f32 %v797_v54, %v1013_v4  ;;  %818 = vpow2.f32 %v724_v19  ;;  %v730_v12 = vmul.f32 -1.442695, %v425_v40  ;;  %v731_v21 = vmul.f32 -1.442695, %v426_v17  ;;  %v1424_v11 = vld [vmem:[#allocation18_spill] sm:$0xff] }
  0xf9   :  { %v801_v45 = vpop.eup %800  ;;  %663 = vst [vmem:[#allocation5] sm:$0xff] %v631_v36  ;;  %v637_v9 = vmul.f32 %v799_v28, %v1015_v5  ;;  %820 = vpow2.f32 %v725_v3  ;;  %v273_v58 = vmul.f32 4.0, %v257_v47  ;;  %v261_v63 = vadd.f32 0.0001, %v245_v53  ;;  %v1423_v53 = vld [vmem:[#allocation17_spill] sm:$0xff] }
  0xfa   :  { %v803_v16 = vpop.eup %802  ;;  %664 = vst [vmem:[#allocation5 + $0x8] sm:$0xff] %v632_v8  ;;  %v638_v2 = vmul.f32 %v801_v45, %v1017_v6  ;;  %822 = vpow2.f32 %v730_v12  ;;  %v334_v4 = vsub.f32 %v1067_v31, %v1243_v24  ;;  %v276_v5 = vmul.f32 4.0, %v260_v25  ;;  %v1415_v31 = vld [vmem:[#allocation9_spill] sm:$0xff]  ;;  %v1426_v12 = vld [vmem:[#allocation20_spill] sm:$0xff] }
  0xfb   :  { %v805_v30 = vpop.eup %804  ;;  %669 = vst [vmem:[#allocation5 + $0x30] sm:$0xff] %v637_v9  ;;  %v635_v51 = vmul.f32 %v803_v16, %v1005_v0  ;;  %824 = vpow2.f32 %v731_v21  ;;  %v331_v62 = vsub.f32 %v1069_v32, %v1255_v22  ;;  %v275_v6 = vmul.f32 4.0, %v259_v52  ;;  %v1417_v32 = vld [vmem:[#allocation10_spill] sm:$0xff] }
  0xfc   :  { %v807_v46 = vpop.eup %806  ;;  %670 = vst [vmem:[#allocation5 + $0x38] sm:$0xff] %v638_v2  ;;  %v636_v42 = vmul.f32 %v805_v30, %v1414_v59  ;;  %826 = vrcp.f32 %v1310_v57  ;;  %v360_v49 = vmul.f32 %v1248_v26, %v1248_v26  ;;  %v278_v0 = vmul.f32 4.0, %v262_v35  ;;  %v1418_v26 = vld [vmem:[#allocation11_spill] sm:$0xff] }
  0xfd   :  { %v809_v39 = vpop.eup %808  ;;  %667 = vst [vmem:[#allocation5 + $0x20] sm:$0xff] %v635_v51  ;;  %v641_v24 = vmul.f32 %v807_v46, %v1415_v31  ;;  %828 = vrcp.f32 %v274_v56  ;;  %v332_v15 = vsub.f32 %v1416_v27, %v1255_v22  ;;  %v277_v18 = vmul.f32 4.0, %v261_v63  ;;  %v1420_v22 = vld [vmem:[#allocation12_spill] sm:$0xff] }
  0xfe   :  { %v811_v50 = vpop.eup %810  ;;  %668 = vst [vmem:[#allocation5 + $0x28] sm:$0xff] %v636_v42  ;;  %v642_v41 = vmul.f32 %v809_v39, %v1417_v32  ;;  %830 = vrcp.f32 %v273_v58  ;;  %v365_v29 = vmul.f32 %v1265_v14, %v1265_v14  ;;  %v366_v19 = vmul.f32 %v334_v4, %v334_v4  ;;  %v1422_v14 = vld [vmem:[#allocation16_spill] sm:$0xff] }
  0xff   :  { %v813_v57 = vpop.eup %812  ;;  %673 = vst [vmem:[#allocation5 + $0x50] sm:$0xff] %v641_v24  ;;  %v639_v47 = vmul.f32 %v811_v50, %v1418_v26  ;;  %832 = vrcp.f32 %v276_v5  ;;  %v363_v38 = vmul.f32 %v331_v62, %v331_v62  ;;  %v337_v23 = vsub.f32 %v1419_v37, %v1270_v55 }
 0x100   :  { %v815_v20 = vpop.eup %814  ;;  %674 = vst [vmem:[#allocation5 + $0x58] sm:$0xff] %v642_v41  ;;  %v640_v1 = vmul.f32 %v813_v57, %v1420_v22  ;;  %834 = vrcp.f32 %v275_v6  ;;  %v338_v10 = vsub.f32 %v1421_v48, %v1270_v55  ;;  %v335_v61 = vsub.f32 %v1422_v14, %v1282_v33  ;;  %v1425_v55 = vld [vmem:[#allocation19_spill] sm:$0xff] }
 0x101   :  { %v817_v3 = vpop.eup %816  ;;  %671 = vst [vmem:[#allocation5 + $0x40] sm:$0xff] %v639_v47  ;;  %v549_v34 = vadd.f32 1.0, %v815_v20  ;;  %836 = vrcp.f32 %v278_v0  ;;  %v336_v43 = vsub.f32 %v1423_v53, %v1282_v33  ;;  %v341_v40 = vsub.f32 %v1424_v11, %v1285_v60 }
 0x102   :  { %v819_v44 = vpop.eup %818  ;;  %672 = vst [vmem:[#allocation5 + $0x48] sm:$0xff] %v640_v1  ;;  %v550_v17 = vadd.f32 1.0, %v817_v3  ;;  %838 = vrcp.f32 %v277_v18  ;;  %v364_v36 = vmul.f32 %v332_v15, %v332_v15  ;;  %v342_v25 = vsub.f32 %v1425_v55, %v1285_v60  ;;  %v908_v3 = vld [vmem:[#allocation2 + $0x70] sm:$0xff] }
 0x103   :  { %v821_v54 = vpop.eup %820  ;;  %840 = vrcp.f32 %v549_v34  ;;  %v547_v52 = vadd.f32 1.0, %v819_v44  ;;  %v369_v8 = vmul.f32 %v337_v23, %v337_v23  ;;  %v339_v21 = vsub.f32 %v1426_v12, %v1300_v7  ;;  %v909_v34 = vld [vmem:[#allocation2 + $0x78] sm:$0xff] }
 0x104   :  { %v823_v28 = vpop.eup %822  ;;  %842 = vrcp.f32 %v550_v17  ;;  %v548_v33 = vadd.f32 1.0, %v821_v54  ;;  %v370_v9 = vmul.f32 %v338_v10, %v338_v10  ;;  %v367_v56 = vmul.f32 %v335_v61, %v335_v61 }
 0x105   :  { %v825_v45 = vpop.eup %824  ;;  %844 = vrcp.f32 %v547_v52  ;;  %v553_v35 = vadd.f32 1.0, %v823_v28  ;;  %v368_v2 = vmul.f32 %v336_v43, %v336_v43  ;;  %v373_v58 = vmul.f32 %v341_v40, %v341_v40  ;;  %v910_v40 = vld [vmem:[#allocation2 + $0x60] sm:$0xff] }
 0x106   :  { %v827_v16 = vpop.eup %826  ;;  %846 = vrcp.f32 %v548_v33  ;;  %v554_v63 = vadd.f32 1.0, %v825_v45  ;;  %v374_v30 = vmul.f32 %v342_v25, %v342_v25  ;;  %v1359_v46 = vmul.f32 %v339_v21, %v339_v21  ;;  %v911_v25 = vld [vmem:[#allocation2 + $0x68] sm:$0xff]  ;;  %v912_v21 = vld [vmem:[#allocation2 + $0x90] sm:$0xff] }
 0x107   :  { %v829_v60 = vpop.eup %828  ;;  %848 = vrcp.f32 %v553_v35  ;;  %v391_v4 = vmul.f32 %v827_v16, %v1252_v13  ;;  %v392_v51 = vmul.f32 %v827_v16, %v360_v49 }
 0x108   :  { %v831_v5 = vpop.eup %830  ;;  %850 = vrcp.f32 %v554_v63  ;;  %v397_v62 = vmul.f32 %v829_v60, %v365_v29  ;;  %v398_v59 = vmul.f32 %v829_v60, %v366_v19 }
 0x109   :  { %v833_v42 = vpop.eup %832  ;;  %v423_v6 = vadd.f32 0.5, %v391_v4  ;;  %v424_v39 = vadd.f32 0.5, %v392_v51  ;;  %v395_v31 = vmul.f32 %v831_v5, %v363_v38  ;;  %v396_v24 = vmul.f32 %v831_v5, %v364_v36 }
 0x10a   :  { %v835_v0 = vpop.eup %834  ;;  %v429_v50 = vadd.f32 0.5, %v397_v62  ;;  %v430_v27 = vadd.f32 0.5, %v398_v59  ;;  %v401_v15 = vmul.f32 %v833_v42, %v369_v8  ;;  %v402_v32 = vmul.f32 %v833_v42, %v370_v9 }
 0x10b   :  { %v837_v41 = vpop.eup %836  ;;  %v728_v18 = vmul.f32 -1.442695, %v423_v6  ;;  %v729_v13 = vmul.f32 -1.442695, %v424_v39  ;;  %v427_v49 = vadd.f32 0.5, %v395_v31  ;;  %v428_v57 = vadd.f32 0.5, %v396_v24 }
 0x10c   :  { %v1361_v26 = vpop.eup %838  ;;  %v734_v47 = vmul.f32 -1.442695, %v429_v50  ;;  %v735_v29 = vmul.f32 -1.442695, %v430_v27  ;;  %v433_v19 = vadd.f32 0.5, %v401_v15  ;;  %v434_v20 = vadd.f32 0.5, %v402_v32 }
 0x10d   :  { %v841_v37 = vpop.eup %840  ;;  %852 = vpow2.f32 %v728_v18  ;;  %v732_v38 = vmul.f32 -1.442695, %v427_v49  ;;  %v733_v23 = vmul.f32 -1.442695, %v428_v57  ;;  %v399_v22 = vmul.f32 %v835_v0, %v367_v56  ;;  %v913_v56 = vld [vmem:[#allocation2 + $0x98] sm:$0xff] }
 0x10e   :  { %v843_v1 = vpop.eup %842  ;;  %v645_v48 = vmul.f32 %v908_v3, %v841_v37  ;;  %854 = vpow2.f32 %v729_v13  ;;  %v738_v10 = vmul.f32 -1.442695, %v433_v19  ;;  %v739_v14 = vmul.f32 -1.442695, %v434_v20 }
 0x10f   :  { %v845_v61 = vpop.eup %844  ;;  %v646_v44 = vmul.f32 %v909_v34, %v843_v1  ;;  %856 = vpow2.f32 %v734_v47  ;;  %v400_v53 = vmul.f32 %v835_v0, %v368_v2  ;;  %v431_v43 = vadd.f32 0.5, %v399_v22  ;;  %v916_v34 = vld [vmem:[#allocation2 + $0x88] sm:$0xff] }
 0x110   :  { %v847_v11 = vpop.eup %846  ;;  %677 = vst [vmem:[#allocation5 + $0x70] sm:$0xff] %v645_v48  ;;  %v643_v17 = vmul.f32 %v910_v40, %v845_v61  ;;  %858 = vpow2.f32 %v735_v29  ;;  %v405_v54 = vmul.f32 %v837_v41, %v373_v58  ;;  %v406_v36 = vmul.f32 %v837_v41, %v374_v30  ;;  %v1365_v58 = vld [vmem:[#allocation2 + $0xe8] sm:$0xff] }
 0x111   :  { %v849_v55 = vpop.eup %848  ;;  %678 = vst [vmem:[#allocation5 + $0x78] sm:$0xff] %v646_v44  ;;  %v644_v52 = vmul.f32 %v911_v25, %v847_v11  ;;  %860 = vpow2.f32 %v732_v38  ;;  %v432_v28 = vadd.f32 0.5, %v400_v53  ;;  %v736_v8 = vmul.f32 -1.442695, %v431_v43  ;;  %v917_v43 = vld [vmem:[#allocation2 + $0xb0] sm:$0xff] }
 0x112   :  { %v851_v12 = vpop.eup %850  ;;  %675 = vst [vmem:[#allocation5 + $0x60] sm:$0xff] %v643_v17  ;;  %v649_v33 = vmul.f32 %v912_v21, %v849_v55  ;;  %862 = vpow2.f32 %v733_v23  ;;  %v437_v45 = vadd.f32 0.5, %v405_v54  ;;  %v438_v9 = vadd.f32 0.5, %v406_v36  ;;  %v918_v17 = vld [vmem:[#allocation2 + $0xb8] sm:$0xff]  ;;  %v919_v55 = vld [vmem:[#allocation2 + $0xa0] sm:$0xff]  ;;  %v921_v21 = vld [vmem:[#allocation2 + $0xd0] sm:$0xff] }
 0x113   :  { %676 = vst [vmem:[#allocation5 + $0x68] sm:$0xff] %v644_v52  ;;  %v650_v35 = vmul.f32 %v913_v56, %v851_v12  ;;  %864 = vpow2.f32 %v738_v10  ;;  %v737_v16 = vmul.f32 -1.442695, %v432_v28  ;;  %v403_v2 = vmul.f32 %v1361_v26, %v1359_v46  ;;  %v915_v10 = vld [vmem:[#allocation2 + $0x80] sm:$0xff]  ;;  %v920_v28 = vld [vmem:[#allocation2 + $0xa8] sm:$0xff] }
 0x114   :  { %v340_v63 = vsub.f32 %v1365_v58, %v1300_v7  ;;  %681 = vst [vmem:[#allocation5 + $0x90] sm:$0xff] %v649_v33  ;;  %866 = vpow2.f32 %v739_v14  ;;  %v742_v60 = vmul.f32 -1.442695, %v437_v45  ;;  %v743_v30 = vmul.f32 -1.442695, %v438_v9  ;;  %v922_v9 = vld [vmem:[#allocation2 + $0xd8] sm:$0xff] }
 0x115   :  { %682 = vst [vmem:[#allocation5 + $0x98] sm:$0xff] %v650_v35  ;;  %868 = vpow2.f32 %v736_v8  ;;  %v435_v4 = vadd.f32 0.5, %v403_v2 }
 0x116   :  { %870 = vpow2.f32 %v737_v16  ;;  %v372_v59 = vmul.f32 %v340_v63, %v340_v63  ;;  %v923_v16 = vld [vmem:[#allocation2 + $0xc0] sm:$0xff] }
 0x117   :  { %v853_v51 = vpop.eup %852  ;;  %872 = vpow2.f32 %v742_v60  ;;  %v740_v5 = vmul.f32 -1.442695, %v435_v4  ;;  %v924_v60 = vld [vmem:[#allocation2 + $0xc8] sm:$0xff] }
 0x118   :  { %v855_v62 = vpop.eup %854  ;;  %v551_v42 = vadd.f32 1.0, %v853_v51  ;;  %874 = vpow2.f32 %v743_v30  ;;  %v404_v31 = vmul.f32 %v1361_v26, %v372_v59  ;;  %v925_v51 = vld [vmem:[#allocation2 + $0xf0] sm:$0xff]  ;;  %v926_v59 = vld [vmem:[#allocation2 + $0xf8] sm:$0xff] }
 0x119   :  { %v857_v46 = vpop.eup %856  ;;  %v552_v6 = vadd.f32 1.0, %v855_v62  ;;  %876 = vpow2.f32 %v740_v5 }
 0x11a   :  { %v859_v39 = vpop.eup %858  ;;  %878 = vrcp.f32 %v551_v42  ;;  %v557_v7 = vadd.f32 1.0, %v857_v46  ;;  %v436_v13 = vadd.f32 0.5, %v404_v31 }
 0x11b   :  { %v861_v24 = vpop.eup %860  ;;  %880 = vrcp.f32 %v552_v6  ;;  %v558_v0 = vadd.f32 1.0, %v859_v39  ;;  %v927_v39 = vld [vmem:[#allocation2 + $0xe0] sm:$0xff] }
 0x11c   :  { %v863_v50 = vpop.eup %862  ;;  %882 = vrcp.f32 %v557_v7  ;;  %v555_v27 = vadd.f32 1.0, %v861_v24  ;;  %v741_v38 = vmul.f32 -1.442695, %v436_v13 }
 0x11d   :  { %v865_v15 = vpop.eup %864  ;;  %884 = vrcp.f32 %v558_v0  ;;  %v556_v32 = vadd.f32 1.0, %v863_v50 }
 0x11e   :  { %v867_v41 = vpop.eup %866  ;;  %886 = vrcp.f32 %v555_v27  ;;  %v561_v18 = vadd.f32 1.0, %v865_v15 }
 0x11f   :  { %v869_v49 = vpop.eup %868  ;;  %888 = vrcp.f32 %v556_v32  ;;  %v562_v57 = vadd.f32 1.0, %v867_v41 }
 0x120   :  { %v871_v47 = vpop.eup %870  ;;  %890 = vrcp.f32 %v561_v18  ;;  %v559_v29 = vadd.f32 1.0, %v869_v49 }
 0x121   :  { %v873_v26 = vpop.eup %872  ;;  %892 = vrcp.f32 %v562_v57  ;;  %v560_v19 = vadd.f32 1.0, %v871_v47 }
 0x122   :  { %v875_v20 = vpop.eup %874  ;;  %894 = vrcp.f32 %v559_v29  ;;  %v565_v37 = vadd.f32 1.0, %v873_v26 }
 0x123   :  { %v877_v23 = vpop.eup %876  ;;  %896 = vrcp.f32 %v560_v19  ;;  %v566_v22 = vadd.f32 1.0, %v875_v20 }
 0x124   :  { %v879_v1 = vpop.eup %878  ;;  %898 = vrcp.f32 %v565_v37  ;;  %v563_v3 = vadd.f32 1.0, %v877_v23 }
 0x125   :  { %v881_v48 = vpop.eup %880  ;;  %v647_v14 = vmul.f32 %v915_v10, %v879_v1  ;;  %900 = vrcp.f32 %v566_v22 }
 0x126   :  { %v883_v61 = vpop.eup %882  ;;  %v648_v44 = vmul.f32 %v916_v34, %v881_v48  ;;  %902 = vpow2.f32 %v741_v38 }
 0x127   :  { %v885_v53 = vpop.eup %884  ;;  %679 = vst [vmem:[#allocation5 + $0x80] sm:$0xff] %v647_v14  ;;  %v653_v11 = vmul.f32 %v917_v43, %v883_v61  ;;  %904 = vrcp.f32 %v563_v3 }
 0x128   :  { %v887_v40 = vpop.eup %886  ;;  %680 = vst [vmem:[#allocation5 + $0x88] sm:$0xff] %v648_v44  ;;  %v654_v54 = vmul.f32 %v918_v17, %v885_v53 }
 0x129   :  { %v889_v36 = vpop.eup %888  ;;  %685 = vst [vmem:[#allocation5 + $0xb0] sm:$0xff] %v653_v11  ;;  %v651_v25 = vmul.f32 %v919_v55, %v887_v40 }
 0x12a   :  { %v891_v52 = vpop.eup %890  ;;  %686 = vst [vmem:[#allocation5 + $0xb8] sm:$0xff] %v654_v54  ;;  %v652_v8 = vmul.f32 %v920_v28, %v889_v36 }
 0x12b   :  { %v893_v12 = vpop.eup %892  ;;  %683 = vst [vmem:[#allocation5 + $0xa0] sm:$0xff] %v651_v25  ;;  %v657_v33 = vmul.f32 %v921_v21, %v891_v52 }
 0x12c   :  { %v895_v45 = vpop.eup %894  ;;  %684 = vst [vmem:[#allocation5 + $0xa8] sm:$0xff] %v652_v8  ;;  %v658_v56 = vmul.f32 %v922_v9, %v893_v12 }
 0x12d   :  { %v897_v35 = vpop.eup %896  ;;  %689 = vst [vmem:[#allocation5 + $0xd0] sm:$0xff] %v657_v33  ;;  %v655_v2 = vmul.f32 %v923_v16, %v895_v45 }
 0x12e   :  { %v899_v63 = vpop.eup %898  ;;  %690 = vst [vmem:[#allocation5 + $0xd8] sm:$0xff] %v658_v56  ;;  %v656_v30 = vmul.f32 %v924_v60, %v897_v35 }
 0x12f   :  { %v901_v4 = vpop.eup %900  ;;  %687 = vst [vmem:[#allocation5 + $0xc0] sm:$0xff] %v655_v2  ;;  %v661_v5 = vmul.f32 %v925_v51, %v899_v63 }
 0x130   :  { %v903_v62 = vpop.eup %902  ;;  %688 = vst [vmem:[#allocation5 + $0xc8] sm:$0xff] %v656_v30  ;;  %v662_v42 = vmul.f32 %v926_v59, %v901_v4 }
 0x131   :  { %v905_v46 = vpop.eup %904  ;;  %693 = vst [vmem:[#allocation5 + $0xf0] sm:$0xff] %v661_v5  ;;  %v564_v6 = vadd.f32 1.0, %v903_v62 }
 0x132   :  { %694 = vst [vmem:[#allocation5 + $0xf8] sm:$0xff] %v662_v42  ;;  %v659_v7 = vmul.f32 %v927_v39, %v905_v46 }
 0x133   :  { %906 = vrcp.f32 %v564_v6 }
 0x134   :  { %691 = vst [vmem:[#allocation5 + $0xe0] sm:$0xff] %v659_v7 }
 0x13d   :  { %v907_v31 = vpop.eup %906 }
 0x13e   :  { %v660_v24 = vmul.f32 %v1365_v58, %v907_v31 }
 0x140   :  { %692 = vst [vmem:[#allocation5 + $0xe8] sm:$0xff] %v660_v24 }
 0x141   :  { %961 = shalt.err (!%p958_p12)
}
 0x142   :  { %s962_s24 = scalar_lea.hbm %s1387_s1, 4096 }
 0x143   :  { %p963_p13 = scmp.ne.s32.totalorder %s1387_s1, %s962_s24  ;;  %p966_p0 = scmp.lt.u32.totalorder %s962_s24, %s1387_s1 }
 0x145   :  { %p968_p1 = pnand %p966_p0, %p963_p13 }
 0x147   :  { %971 = shalt.err (!%p968_p1)
}
 0x148   :  { %706 = dma.vmem_to_hbm [thread:$0]  %s701_s20, 4096, %s1387_s1, [#allocation4], %s977_s16, %s977_s16, %s978_s17  }
 0x149   :  { %974 = dma.done.wait [#allocation4], 4096  }
 0x14a   :  { %975 = vsyncadd [#allocation4], 4294963200 }
 0x14b   :  { %710 = vsyncpa [#allocation3], 1 }
 0x14c   :  { %711 = vsyncpa [#allocation4], 1 }

</bundles_post_ra>
